<compile_context>
chip_gen: v5e
topology: v5e:2x2
jax: 0.10.0
libtpu: 0.0.40
codegen_flags: <defaults>
</compile_context>

<pallas_src>
import functools
import math

import jax
import jax.numpy as jnp
import numpy as np
from jax.experimental import pallas as pl
from jax.experimental.pallas import tpu as pltpu


# ----------------------------------------------------------------------------
# Single fused kernel:
#   conv-as-im2col-matmul (all phases at once) -> running max (= MaxPool2d) ->
#   +bias -> ReLU -> layout swap via selection matmul -> FC1 (BN folded) ->
#   FC2 -> softmax
# ----------------------------------------------------------------------------
def _cnnlite_kernel(pat_ref, wc_ref, bc_ref, sof_ref, cof_ref,
                    w1_ref, b1_ref, w2_ref, b2_ref, o_ref,
                    *, num_phases, s_pad):
    # pat_ref: (Jpad, num_phases*B*s_pad)  im2col patch columns (p, b, s)
    # wc_ref : (Cout, Jpad)                raw conv weight, patch order (ci,kh,kw)
    # bc_ref : (Cout, 1)                   conv bias (per-channel column)
    # sof_ref: (1, F) int32                s (= hp*Wp+wp) of feature f
    # cof_ref: (1, F) int32                c of feature f   (f = c*S + s)
    # w1_ref : (F, hidden)  FC1 weight, eval-BN folded, PyTorch feature order
    # b1_ref : (1, hidden)  folded BN bias
    # w2_ref : (hidden, n_class);  b2_ref: (1, n_class)
    B = o_ref.shape[0]
    C = wc_ref.shape[0]
    F = w1_ref.shape[0]
    BL = B * s_pad

    # (1) conv for every (phase, batch, pooled position) column as ONE matmul:
    #     the im2col RHS is pushed into the MXU exactly once.
    conv = jnp.dot(wc_ref[...], pat_ref[...],
                   preferred_element_type=jnp.float32)          # (C, P*BL)

    # (2) MaxPool2d == running max over the pool*pool phase groups.  Each
    #     group is a 128-lane-aligned slice, so this is cheap VPU work.
    pooled = conv[:, 0:BL]
    for p in range(1, num_phases):
        pooled = jnp.maximum(pooled, conv[:, p * BL:(p + 1) * BL])

    # (3) conv bias + ReLU (both commute with the max -> exact after pooling).
    pooled = jnp.maximum(pooled + bc_ref[...], 0.0)             # (C, BL)

    # (4) relayout (c rows, (b, s) lanes) -> (b rows, f=(c,hp,wp) lanes):
    #     one 0/1 selection matmul per batch row + one-hot channel mask +
    #     sublane reduce.  Masks are built from iotas (zero HBM bytes); avoids
    #     any in-kernel reshape/transpose of the minor dims.
    lane = jax.lax.broadcasted_iota(jnp.int32, (BL, F), 0)
    cidx = jax.lax.broadcasted_iota(jnp.int32, (C, F), 0)
    ch_mask = (cidx == cof_ref[...]).astype(jnp.float32)        # (C, F)
    row = jax.lax.broadcasted_iota(jnp.int32, (B, F), 0)
    feats = jnp.zeros((B, F), jnp.float32)
    for b in range(B):
        sel = (lane == sof_ref[...] + b * s_pad).astype(jnp.float32)   # (BL, F)
        gb = jnp.dot(pooled, sel, preferred_element_type=jnp.float32)  # (C, F)
        gb_row = jnp.sum(gb * ch_mask, axis=0, keepdims=True)          # (1, F)
        feats = jnp.where(row == b, gb_row, feats)                      # place row b

    # (5) FC1 (bias-free Linear with eval-mode BatchNorm1d folded) -> FC2.
    h = jnp.dot(feats, w1_ref[...],
                preferred_element_type=jnp.float32) + b1_ref[...]       # (B, hidden)
    logits = jnp.dot(h, w2_ref[...],
                     preferred_element_type=jnp.float32) + b2_ref[...]  # (B, n_class)

    # (6) softmax over classes (n_class > 1 branch of CNNLite.decision).
    m = jnp.max(logits, axis=-1, keepdims=True)
    e = jnp.exp(logits - m)
    inv = pl.reciprocal(jnp.sum(e, axis=-1, keepdims=True))  # exact (1e-5 parity)
    o_ref[...] = (e * inv).astype(o_ref.dtype)


def cnnlite_fused(pat, w_flat, b_col, s_of_f, c_of_f, w1, b1, w2, b2, *,
                  num_phases, s_pad):
    B = pat.shape[1] // (num_phases * s_pad)
    n_class = w2.shape[1]
    vmem = pl.BlockSpec(memory_space=pltpu.MemorySpace.VMEM)
    kernel = functools.partial(_cnnlite_kernel,
                               num_phases=num_phases, s_pad=s_pad)
    # Single block, no grid: the whole working set (~0.4 MiB) is VMEM-resident
    # and only the tiny (B, n_class) result goes back to HBM.
    return pl.pallas_call(
        kernel,
        out_shape=jax.ShapeDtypeStruct((B, n_class), jnp.float32),
        in_specs=[vmem] * 9,
        out_specs=vmem,
    )(pat, w_flat, b_col, s_of_f, c_of_f, w1, b1, w2, b2)


# ----------------------------------------------------------------------------
# One-time constant folding of the PyTorch parameters into kernel-ready form.
# ----------------------------------------------------------------------------
def prepare_params(params, *, input_shape, kernel_size, pool, eps=1e-5):
    (w_conv, b_conv, w_fc1, gamma, beta, rmean, rvar, w_fc2, b_fc2) = params
    cin, H, W = input_shape
    cout = w_conv.shape[0]
    K = kernel_size
    Ho, Wo = H - K + 1, W - K + 1
    Hp, Wp = Ho // pool, Wo // pool
    S = Hp * Wp
    F = cout * S
    hidden = w_fc1.shape[0]
    J = cin * K * K
    Jpad = -(-J // 8) * 8   # pad contraction dim to a sublane multiple

    # Exactness precondition: every MaxPool window reads only valid conv rows.
    assert pool * Hp <= Ho and pool * Wp <= Wo

    # Raw conv weight as (Cout, Cin*K*K); patch order (ci, kh, kw) matches the
    # wrapper's im2col.  Zero-padded to Jpad (zeros contribute nothing).
    w_flat = jnp.pad(w_conv.reshape(cout, J).astype(jnp.float32),
                     ((0, 0), (0, Jpad - J)))
    b_col = b_conv.reshape(cout, 1).astype(jnp.float32)

    # Feature index f = c*S + s  (PyTorch flatten order (c, hp, wp)).
    f = np.arange(F, dtype=np.int32)
    c_of_f = jnp.asarray((f // S).reshape(1, F), jnp.int32)
    s_of_f = jnp.asarray((f % S).reshape(1, F), jnp.int32)

    # FC1 with eval-mode BatchNorm1d folded:  y = (x @ W1)*g + (beta - mean*g).
    g = gamma / jnp.sqrt(rvar + eps)
    w1 = (w_fc1 * g[:, None]).T.astype(jnp.float32)          # (F, hidden)
    b1 = (beta - rmean * g).reshape(1, hidden).astype(jnp.float32)
    w2 = w_fc2.T.astype(jnp.float32)                          # (hidden, n_class)
    b2 = b_fc2.reshape(1, -1).astype(jnp.float32)
    return (w_flat, b_col, s_of_f, c_of_f, w1, b1, w2, b2)


# ----------------------------------------------------------------------------
# Per-call forward: im2col in the wrapper (~74 KB of pure data movement) +
# one pallas_call.
# ----------------------------------------------------------------------------
def cnnlite_forward(x, kernel_params, *, pool, kernel_size):
    (w_flat, b_col, s_of_f, c_of_f, w1, b1, w2, b2) = kernel_params
    B, Cin, H, W = x.shape
    K = kernel_size
    Ho, Wo = H - K + 1, W - K + 1
    Hp, Wp = Ho // pool, Wo // pool
    S = Hp * Wp
    P = pool * pool
    J = Cin * K * K
    Jpad = w_flat.shape[1]

    # Pad the per-batch position stride so each phase's lane group (B * s_pad)
    # is a multiple of 128 -> all phase slices in the kernel are lane-aligned.
    base = 128 // math.gcd(128, B)
    s_pad = -(-S // base) * base

    # im2col over ALL stride-1 conv output positions (the union of the
    # pool*pool MaxPool phases), as (patch, (phase, batch, position)) columns.
    slices = [x[:, :, kh:kh + Ho, kw:kw + Wo]
              for kh in range(K) for kw in range(K)]           # each (B,Cin,Ho,Wo)
    pat = jnp.stack(slices, axis=2).reshape(B, J, Ho, Wo)      # j = (ci, kh, kw)
    pat = pat.reshape(B, J, Hp, pool, Wp, pool)                # ho=(hp,dh), wo=(wp,dw)
    pat = pat.transpose(1, 3, 5, 0, 2, 4)                      # (j, dh, dw, b, hp, wp)
    pat = pat.reshape(J, P, B, S)
    pat = jnp.pad(pat, ((0, Jpad - J), (0, 0), (0, 0), (0, s_pad - S)))
    pat = pat.reshape(Jpad, P * B * s_pad)
    return cnnlite_fused(pat, w_flat, b_col, s_of_f, c_of_f, w1, b1, w2, b2,
                         num_phases=P, s_pad=s_pad)


# ----------------------------------------------------------------------------
# Pure-JAX reference (independent path, for correctness check).
# ----------------------------------------------------------------------------
def cnnlite_reference(x, params, *, pool):
    (w_conv, b_conv, w_fc1, gamma, beta, rmean, rvar, w_fc2, b_fc2) = params
    conv = jax.lax.conv_general_dilated(
        x, w_conv, window_strides=(1, 1), padding="VALID",
        dimension_numbers=("NCHW", "OIHW", "NCHW"))
    conv = jnp.maximum(conv + b_conv[None, :, None, None], 0.0)
    pooled = jax.lax.reduce_window(
        conv, -jnp.inf, jax.lax.max,
        (1, 1, pool, pool), (1, 1, pool, pool), "VALID")
    flat = pooled.reshape(pooled.shape[0], -1)
    h = flat @ w_fc1.T
    h = (h - rmean) / jnp.sqrt(rvar + 1e-5) * gamma + beta
    logits = h @ w_fc2.T + b_fc2
    return jax.nn.softmax(logits, axis=1)


if __name__ == "__main__":
    # Shapes consistent with CNNLite(input_shape=(4,16,16), n_class=10,
    # n_kern=8, kernel_size=3, pool=2, hidden=32, bn=True, dropout=None).
    B, Cin, H, W = 2, 4, 16, 16
    n_kern, K, pool, hidden, n_class = 8, 3, 2, 32, 10
    Ho, Wo = H - K + 1, W - K + 1
    Hp, Wp = Ho // pool, Wo // pool
    F = n_kern * Hp * Wp

    key = jax.random.PRNGKey(0)
    ks = jax.random.split(key, 10)
    x = jax.random.normal(ks[0], (B, Cin, H, W), jnp.float32)

    w_conv = 0.1 * jax.random.normal(ks[1], (n_kern, Cin, K, K), jnp.float32)
    b_conv = 0.1 * jax.random.normal(ks[2], (n_kern,), jnp.float32)
    w_fc1 = 0.05 * jax.random.normal(ks[3], (hidden, F), jnp.float32)  # bias=False
    gamma = 1.0 + 0.1 * jax.random.normal(ks[4], (hidden,), jnp.float32)
    beta = 0.1 * jax.random.normal(ks[5], (hidden,), jnp.float32)
    rmean = 0.1 * jax.random.normal(ks[6], (hidden,), jnp.float32)
    rvar = 1.0 + 0.1 * jnp.abs(jax.random.normal(ks[7], (hidden,), jnp.float32))
    w_fc2 = 0.1 * jax.random.normal(ks[8], (n_class, hidden), jnp.float32)
    b_fc2 = 0.1 * jax.random.normal(ks[9], (n_class,), jnp.float32)

    params = (w_conv, b_conv, w_fc1, gamma, beta, rmean, rvar, w_fc2, b_fc2)

    # One-time constant folding (weight flattening, BN fold, feature index
    # tables), kept OUT of the per-call jitted path.
    kernel_params = jax.block_until_ready(
        prepare_params(params, input_shape=(Cin, H, W), kernel_size=K, pool=pool))

    fwd = jax.jit(functools.partial(cnnlite_forward, pool=pool, kernel_size=K))
    out = jax.block_until_ready(fwd(x, kernel_params))

    ref = jax.block_until_ready(cnnlite_reference(x, params, pool=pool))
    assert out.shape == (B, n_class), out.shape
    assert jnp.allclose(out, ref, atol=1e-5, rtol=1e-5), (
        f"max abs diff = {jnp.max(jnp.abs(out - ref))}")
    assert jnp.allclose(jnp.sum(out, axis=1), 1.0, atol=1e-5)

    print("KERNEL_OK")
</pallas_src>

<mosaic_0001>
module attributes {stable_mosaic.version = 11 : i64} {
  func.func @_cnnlite_kernel(%arg0: memref<40x512xf32, #tpu.memory_space<vmem>>, %arg1: memref<8x40xf32, #tpu.memory_space<vmem>>, %arg2: memref<8x1xf32, #tpu.memory_space<vmem>>, %arg3: memref<1x392xi32, #tpu.memory_space<vmem>>, %arg4: memref<1x392xi32, #tpu.memory_space<vmem>>, %arg5: memref<392x32xf32, #tpu.memory_space<vmem>>, %arg6: memref<1x32xf32, #tpu.memory_space<vmem>>, %arg7: memref<32x10xf32, #tpu.memory_space<vmem>>, %arg8: memref<1x10xf32, #tpu.memory_space<vmem>>, %arg9: memref<2x10xf32, #tpu.memory_space<vmem>>) attributes {dimension_semantics = [], scalar_prefetch = 0 : i64, scratch_operands = 0 : i64, tpu.core_type = #tpu.core_type<tc>} {
    %c0 = arith.constant 0 : index
    %c0_0 = arith.constant 0 : index
    %0 = vector.load %arg1[%c0, %c0_0] : memref<8x40xf32, #tpu.memory_space<vmem>>, vector<8x40xf32>
    %c0_1 = arith.constant 0 : index
    %c0_2 = arith.constant 0 : index
    %1 = vector.load %arg0[%c0_1, %c0_2] : memref<40x512xf32, #tpu.memory_space<vmem>>, vector<40x512xf32>
    %cst = arith.constant dense<0.000000e+00> : vector<8x512xf32>
    %2 = tpu.matmul %0, %1, %cst {dimension_numbers = #tpu.dot_dimension_numbers<[1], [0], [0], [1], [0, 0, 1, 1], [], []>} : vector<8x40xf32>, vector<40x512xf32>, vector<8x512xf32> -> vector<8x512xf32>
    %3 = vector.extract_strided_slice %2 {offsets = [0, 0], sizes = [8, 128], strides = [1, 1]} : vector<8x512xf32> to vector<8x128xf32>
    %4 = vector.extract_strided_slice %2 {offsets = [0, 128], sizes = [8, 128], strides = [1, 1]} : vector<8x512xf32> to vector<8x128xf32>
    %5 = arith.maximumf %3, %4 : vector<8x128xf32>
    %6 = vector.extract_strided_slice %2 {offsets = [0, 256], sizes = [8, 128], strides = [1, 1]} : vector<8x512xf32> to vector<8x128xf32>
    %7 = arith.maximumf %5, %6 : vector<8x128xf32>
    %8 = vector.extract_strided_slice %2 {offsets = [0, 384], sizes = [8, 128], strides = [1, 1]} : vector<8x512xf32> to vector<8x128xf32>
    %9 = arith.maximumf %7, %8 : vector<8x128xf32>
    %c0_3 = arith.constant 0 : index
    %c0_4 = arith.constant 0 : index
    %10 = vector.load %arg2[%c0_3, %c0_4] : memref<8x1xf32, #tpu.memory_space<vmem>>, vector<8x1xf32>
    %11 = vector.broadcast %10 : vector<8x1xf32> to vector<8x128xf32>
    %12 = arith.addf %9, %11 : vector<8x128xf32>
    %cst_5 = arith.constant 0.000000e+00 : f32
    %13 = vector.broadcast %cst_5 : f32 to vector<8x128xf32>
    %14 = arith.maximumf %12, %13 : vector<8x128xf32>
    %15 = tpu.iota {dimensions = array<i32: 0>} : vector<128x392xi32>
    %16 = tpu.iota {dimensions = array<i32: 0>} : vector<8x392xi32>
    %c0_6 = arith.constant 0 : index
    %c0_7 = arith.constant 0 : index
    %17 = vector.load %arg4[%c0_6, %c0_7] : memref<1x392xi32, #tpu.memory_space<vmem>>, vector<1x392xi32>
    %18 = vector.broadcast %17 : vector<1x392xi32> to vector<8x392xi32>
    %19 = arith.cmpi eq, %16, %18 : vector<8x392xi32>
    %20 = arith.extui %19 : vector<8x392xi1> to vector<8x392xi32>
    %21 = arith.sitofp %20 : vector<8x392xi32> to vector<8x392xf32>
    %22 = tpu.iota {dimensions = array<i32: 0>} : vector<2x392xi32>
    %cst_8 = arith.constant 0.000000e+00 : f32
    %23 = vector.broadcast %cst_8 : f32 to vector<2x392xf32>
    %c0_9 = arith.constant 0 : index
    %c0_10 = arith.constant 0 : index
    %24 = vector.load %arg3[%c0_9, %c0_10] : memref<1x392xi32, #tpu.memory_space<vmem>>, vector<1x392xi32>
    %c0_i32 = arith.constant 0 : i32
    %25 = vector.broadcast %c0_i32 : i32 to vector<1x392xi32>
    %26 = arith.addi %24, %25 : vector<1x392xi32>
    %27 = vector.broadcast %26 : vector<1x392xi32> to vector<128x392xi32>
    %28 = arith.cmpi eq, %15, %27 : vector<128x392xi32>
    %29 = arith.extui %28 : vector<128x392xi1> to vector<128x392xi32>
    %30 = arith.sitofp %29 : vector<128x392xi32> to vector<128x392xf32>
    %cst_11 = arith.constant dense<0.000000e+00> : vector<8x392xf32>
    %31 = tpu.matmul %14, %30, %cst_11 {dimension_numbers = #tpu.dot_dimension_numbers<[1], [0], [0], [1], [0, 0, 1, 1], [], []>} : vector<8x128xf32>, vector<128x392xf32>, vector<8x392xf32> -> vector<8x392xf32>
    %32 = arith.mulf %31, %21 : vector<8x392xf32>
    %cst_12 = arith.constant dense<0.000000e+00> : vector<392xf32>
    %33 = vector.multi_reduction <add>, %32, %cst_12 [0] : vector<8x392xf32> to vector<392xf32>
    %34 = vector.shape_cast %33 : vector<392xf32> to vector<1x392xf32>
    %c0_i32_13 = arith.constant 0 : i32
    %35 = vector.broadcast %c0_i32_13 : i32 to vector<2x392xi32>
    %36 = arith.cmpi eq, %22, %35 : vector<2x392xi32>
    %37 = vector.shape_cast %34 : vector<1x392xf32> to vector<1x392xf32>
    %38 = vector.broadcast %37 : vector<1x392xf32> to vector<2x392xf32>
    %39 = arith.select %36, %38, %23 : vector<2x392xi1>, vector<2x392xf32>
    %c0_14 = arith.constant 0 : index
    %c0_15 = arith.constant 0 : index
    %40 = vector.load %arg3[%c0_14, %c0_15] : memref<1x392xi32, #tpu.memory_space<vmem>>, vector<1x392xi32>
    %c64_i32 = arith.constant 64 : i32
    %41 = vector.broadcast %c64_i32 : i32 to vector<1x392xi32>
    %42 = arith.addi %40, %41 : vector<1x392xi32>
    %43 = vector.broadcast %42 : vector<1x392xi32> to vector<128x392xi32>
    %44 = arith.cmpi eq, %15, %43 : vector<128x392xi32>
    %45 = arith.extui %44 : vector<128x392xi1> to vector<128x392xi32>
    %46 = arith.sitofp %45 : vector<128x392xi32> to vector<128x392xf32>
    %cst_16 = arith.constant dense<0.000000e+00> : vector<8x392xf32>
    %47 = tpu.matmul %14, %46, %cst_16 {dimension_numbers = #tpu.dot_dimension_numbers<[1], [0], [0], [1], [0, 0, 1, 1], [], []>} : vector<8x128xf32>, vector<128x392xf32>, vector<8x392xf32> -> vector<8x392xf32>
    %48 = arith.mulf %47, %21 : vector<8x392xf32>
    %cst_17 = arith.constant dense<0.000000e+00> : vector<392xf32>
    %49 = vector.multi_reduction <add>, %48, %cst_17 [0] : vector<8x392xf32> to vector<392xf32>
    %50 = vector.shape_cast %49 : vector<392xf32> to vector<1x392xf32>
    %c1_i32 = arith.constant 1 : i32
    %51 = vector.broadcast %c1_i32 : i32 to vector<2x392xi32>
    %52 = arith.cmpi eq, %22, %51 : vector<2x392xi32>
    %53 = vector.shape_cast %50 : vector<1x392xf32> to vector<1x392xf32>
    %54 = vector.broadcast %53 : vector<1x392xf32> to vector<2x392xf32>
    %55 = arith.select %52, %54, %39 : vector<2x392xi1>, vector<2x392xf32>
    %c0_18 = arith.constant 0 : index
    %c0_19 = arith.constant 0 : index
    %56 = vector.load %arg5[%c0_18, %c0_19] : memref<392x32xf32, #tpu.memory_space<vmem>>, vector<392x32xf32>
    %cst_20 = arith.constant dense<0.000000e+00> : vector<2x32xf32>
    %57 = tpu.matmul %55, %56, %cst_20 {dimension_numbers = #tpu.dot_dimension_numbers<[1], [0], [0], [1], [0, 0, 1, 1], [], []>} : vector<2x392xf32>, vector<392x32xf32>, vector<2x32xf32> -> vector<2x32xf32>
    %c0_21 = arith.constant 0 : index
    %c0_22 = arith.constant 0 : index
    %58 = vector.load %arg6[%c0_21, %c0_22] : memref<1x32xf32, #tpu.memory_space<vmem>>, vector<1x32xf32>
    %59 = vector.broadcast %58 : vector<1x32xf32> to vector<2x32xf32>
    %60 = arith.addf %57, %59 : vector<2x32xf32>
    %c0_23 = arith.constant 0 : index
    %c0_24 = arith.constant 0 : index
    %61 = vector.load %arg7[%c0_23, %c0_24] : memref<32x10xf32, #tpu.memory_space<vmem>>, vector<32x10xf32>
    %cst_25 = arith.constant dense<0.000000e+00> : vector<2x10xf32>
    %62 = tpu.matmul %60, %61, %cst_25 {dimension_numbers = #tpu.dot_dimension_numbers<[1], [0], [0], [1], [0, 0, 1, 1], [], []>} : vector<2x32xf32>, vector<32x10xf32>, vector<2x10xf32> -> vector<2x10xf32>
    %c0_26 = arith.constant 0 : index
    %c0_27 = arith.constant 0 : index
    %63 = vector.load %arg8[%c0_26, %c0_27] : memref<1x10xf32, #tpu.memory_space<vmem>>, vector<1x10xf32>
    %64 = vector.broadcast %63 : vector<1x10xf32> to vector<2x10xf32>
    %65 = arith.addf %62, %64 : vector<2x10xf32>
    %cst_28 = arith.constant dense<0xFF800000> : vector<2xf32>
    %66 = vector.multi_reduction <maximumf>, %65, %cst_28 [1] : vector<2x10xf32> to vector<2xf32>
    %67 = vector.shape_cast %66 : vector<2xf32> to vector<2x1xf32>
    %68 = vector.broadcast %67 : vector<2x1xf32> to vector<2x10xf32>
    %69 = arith.subf %65, %68 : vector<2x10xf32>
    %70 = math.exp %69 : vector<2x10xf32>
    %cst_29 = arith.constant dense<0.000000e+00> : vector<2xf32>
    %71 = vector.multi_reduction <add>, %70, %cst_29 [1] : vector<2x10xf32> to vector<2xf32>
    %72 = vector.shape_cast %71 : vector<2xf32> to vector<2x1xf32>
    %73 = tpu.reciprocal %72 : vector<2x1xf32> -> vector<2x1xf32>
    %74 = vector.broadcast %73 : vector<2x1xf32> to vector<2x10xf32>
    %75 = arith.mulf %70, %74 : vector<2x10xf32>
    %c0_30 = arith.constant 0 : index
    %c0_31 = arith.constant 0 : index
    %76 = vector.load %arg9[%c0_30, %c0_31] : memref<2x10xf32, #tpu.memory_space<vmem>>, vector<2x10xf32>
    tpu.vector_store %arg9[%c0_30, %c0_31], %75 {strides = array<i32>} : memref<2x10xf32, #tpu.memory_space<vmem>>, vector<2x10xf32>,
    return
  }
}

</mosaic_0001>

<bundles_post_ra>
// kernel: cnnlite_forward.1
= control target key start
LH: loop header
LB: loop body
LE: loop exit
PB: predicated region body
PF: predicated region fallthrough
CT: control target
= control target key end

     0   :  { %v149_v3 = vlaneseq  ;;  %v1319_v8 = vmov 0   ;;  %vm54_vm0 = vcmask 326656   ;;  %s2099_s0 = inlined_call_operand.vmem [shape: f32[40,512], index: 0, kind: input, shape index: {}]   ;;  %s2100_s1 = inlined_call_operand.vmem [shape: f32[8,40], index: 1, kind: input, shape index: {}]   ;;  %s2101_s2 = inlined_call_operand.vmem [shape: f32[8,1], index: 2, kind: input, shape index: {}]   ;;  %s2102_s3 = inlined_call_operand.vmem [shape: s32[1,392], index: 3, kind: input, shape index: {}]   ;;  %s2103_s4 = inlined_call_operand.vmem [shape: s32[1,392], index: 4, kind: input, shape index: {}]   ;;  %s2104_s5 = inlined_call_operand.vmem [shape: f32[392,32], index: 5, kind: input, shape index: {}]   ;;  %s2105_s6 = inlined_call_operand.vmem [shape: f32[1,32], index: 6, kind: input, shape index: {}]   ;;  %s2106_s7 = inlined_call_operand.vmem [shape: f32[32,10], index: 7, kind: input, shape index: {}]   ;;  %s2107_s8 = inlined_call_operand.vmem [shape: f32[1,10], index: 8, kind: input, shape index: {}]   ;;  %s2108_s9 = inlined_call_operand.hbm [shape: f32[2,10], index: 9, kind: output, shape index: {}]  }
   0x1   :  { %v50_v0 = vld [vmem:[%s2099_s0 + $0x80] sm:$0xff]  ;;  %v52_v2 = vld [vmem:[%s2099_s0 + $0x90] sm:$0xff]  ;;  %v51_v6 = vld [vmem:[%s2099_s0 + $0x88] sm:$0xff]  ;;  %1286 = vset.pattern.permute.xlu0 %v1319_v8 }
   0x2   :  { %v46_v1 = vld [vmem:[%s2099_s0 + $0x60] sm:$0xff]  ;;  %69 = vmatpush.msra.mxu3 %v50_v0  ;;  %109 = vmatpush.msra.mxu2 %v52_v2  ;;  %v48_v4 = vld [vmem:[%s2099_s0 + $0x70] sm:$0xff]  ;;  %v1394_v9 = vshrl.u32 %v149_v3, 7  ;;  %v47_v10 = vld [vmem:[%s2099_s0 + $0x68] sm:$0xff] }
   0x3   :  { %v42_v5 = vld [vmem:[%s2099_s0 + $0x40] sm:$0xff]  ;;  %v44_v7 = vld [vmem:[%s2099_s0 + $0x50] sm:$0xff]  ;;  %89 = vmatpush.msra.mxu1 %v51_v6  ;;  %v43_v13 = vld [vmem:[%s2099_s0 + $0x48] sm:$0xff] }
   0x4   :  { %70 = vmatpush.msra.mxu3 %v46_v1  ;;  %110 = vmatpush.msra.mxu2 %v48_v4  ;;  %v38_v11 = vld [vmem:[%s2099_s0 + $0x20] sm:$0xff]  ;;  %v40_v12 = vld [vmem:[%s2099_s0 + $0x30] sm:$0xff]  ;;  %v53_v15 = vld [vmem:[%s2099_s0 + $0x98] sm:$0xff]  ;;  %v1418_v17 = vadd.s32 120, %v1394_v9  ;;  %v1432_v21 = vadd.s32 112, %v1394_v9 }
   0x5   :  { %v34_v14 = vld [vmem:[%s2099_s0] sm:$0xff]  ;;  %90 = vmatpush.msra.mxu1 %v47_v10  ;;  %v36_v16 = vld [vmem:[%s2099_s0 + $0x10] sm:$0xff]  ;;  %v39_v22 = vld [vmem:[%s2099_s0 + $0x28] sm:$0xff] }
   0x6   :  { %71 = vmatpush.msra.mxu3 %v42_v5  ;;  %111 = vmatpush.msra.mxu2 %v44_v7  ;;  %v33_v18 = vld [vmem:[%s2100_s1] sm:$0xff]  ;;  %v49_v26 = vld [vmem:[%s2099_s0 + $0x78] sm:$0xff] }
   0x7   :  { %v141_v19 = vld [vmem:[%s2101_s2] sm:$0xff]  ;;  %91 = vmatpush.msra.mxu1 %v43_v13 }
   0x8   :  { %72 = vmatpush.msra.mxu3 %v38_v11  ;;  %112 = vmatpush.msra.mxu2 %v40_v12  ;;  %v1429_v20 = vld [vmem:[%s2102_s3] sm:$0xf] }
   0x9   :  { %144 = vperm.xlu0 %1286, %v141_v19   ;;  %v1438_v23 = vperm.slane %v1429_v20, 0  ;;  %v1441_v24 = vperm.slane %v1429_v20, 1  ;;  %v1444_v25 = vperm.slane %v1429_v20, 2 }
   0xa   :  { %73 = vmatpush.msra.mxu3 %v34_v14  ;;  %113 = vmatpush.msra.mxu2 %v36_v16 }
   0xb   :  { %14 = vsyncpa [#allocation3], 0  ;;  %1018 = vmatmul.msk.f32.vlgmr.msra.gmra.mxu2 %vm54_vm0, %v33_v18  ;;  %v35_v27 = vld [vmem:[%s2099_s0 + $0x8] sm:$0xff]  ;;  %vm248_vm1 = vcmp.eq.s32.totalorder %v1418_v17, %v1438_v23  ;;  %vm250_vm2 = vcmp.eq.s32.totalorder %v1418_v17, %v1444_v25  ;;  %v1458_v28 = vadd.s32 104, %v1394_v9  ;;  %1016 = vmatmul.msk.f32.vlgmr.msra.gmra.mxu3 %vm54_vm0, %v33_v18  ;;  %v45_v29 = vld [vmem:[%s2099_s0 + $0x58] sm:$0xff]  ;;  %v1320_v30 = vmov 1.0  }
   0xc   :  { %129 = vmatpush.msrb.mxu3 %v53_v15  ;;  %92 = vmatpush.msra.mxu1 %v39_v22  ;;  %vm249_vm3 = vcmp.eq.s32.totalorder %v1418_v17, %v1441_v24  ;;  %vm244_vm4 = vcmp.eq.s32.totalorder %v1432_v21, %v1438_v23  ;;  %v41_v31 = vld [vmem:[%s2099_s0 + $0x38] sm:$0xff]  ;;  %v1474_v32 = vperm.slane %v1429_v20, 3  ;;  %vm246_vm5 = vcmp.eq.s32.totalorder %v1432_v21, %v1444_v25  ;;  %v820_v0 = vld [vmem:[%s2104_s5 + $0x70] sm:$0xff]  ;;  %v819_v2 = vld [vmem:[%s2104_s5 + $0x68] sm:$0xff] }
   0xd   :  { %1088 = vmatpush.msk.msra.mxu0 %vm248_vm1, %v1320_v30  ;;  %1120 = vmatpush.msk.msrb.mxu2 %vm250_vm2, %v1320_v30  ;;  %v1479_v33 = vadd.s32 96, %v1394_v9  ;;  %vm245_vm6 = vcmp.eq.s32.totalorder %v1432_v21, %v1441_v24  ;;  %vm240_vm7 = vcmp.eq.s32.totalorder %v1458_v28, %v1438_v23  ;;  %v37_v34 = vld [vmem:[%s2099_s0 + $0x18] sm:$0xff]  ;;  %vm242_vm8 = vcmp.eq.s32.totalorder %v1458_v28, %v1444_v25  ;;  %v836_v1 = vld [vmem:[%s2104_s5 + $0xf0] sm:$0xff]  ;;  %v835_v3 = vld [vmem:[%s2104_s5 + $0xe8] sm:$0xff] }
   0xe   :  { %130 = vmatpush.msrb.mxu3 %v49_v26  ;;  %93 = vmatpush.msra.mxu1 %v35_v27  ;;  %v1494_v35 = vadd.s32 88, %v1394_v9  ;;  %vm241_vm9 = vcmp.eq.s32.totalorder %v1458_v28, %v1441_v24  ;;  %vm251_vm10 = vcmp.eq.s32.totalorder %v1418_v17, %v1474_v32  ;;  %v1506_v36 = vadd.s32 80, %v1394_v9  ;;  %v821_v61 = vld [vmem:[%s2104_s5 + $0x78] sm:$0xff]  ;;  %v818_v4 = vld [vmem:[%s2104_s5 + $0x60] sm:$0xff]  ;;  %v852_v8 = vld [vmem:[%s2104_s5 + $0x170] sm:$0xff] }
   0xf   :  { %1017 = vmatmul.msk.f32.vlgmr.msra.gmra.mxu1 %vm54_vm0, %v33_v18  ;;  %1089 = vmatpush.msk.msra.mxu0 %vm244_vm4, %v1320_v30  ;;  %vm236_vm11 = vcmp.eq.s32.totalorder %v1479_v33, %v1438_v23  ;;  %vm237_vm12 = vcmp.eq.s32.totalorder %v1479_v33, %v1441_v24  ;;  %vm238_vm13 = vcmp.eq.s32.totalorder %v1479_v33, %v1444_v25  ;;  %v1520_v37 = vadd.s32 72, %v1394_v9  ;;  %v837_v62 = vld [vmem:[%s2104_s5 + $0xf8] sm:$0xff]  ;;  %v834_v5 = vld [vmem:[%s2104_s5 + $0xe0] sm:$0xff]  ;;  %v816_v10 = vld [vmem:[%s2104_s5 + $0x50] sm:$0xff] }
  0x10   :  { %131 = vmatpush.msrb.mxu3 %v45_v29  ;;  %1104 = vmatpush.msk.msrb.mxu1 %vm249_vm3, %v1320_v30  ;;  %vm247_vm14 = vcmp.eq.s32.totalorder %v1432_v21, %v1474_v32  ;;  %vm232_vm15 = vcmp.eq.s32.totalorder %v1494_v35, %v1438_v23  ;;  %vm233_vm1 = vcmp.eq.s32.totalorder %v1494_v35, %v1441_v24  ;;  %v1535_v38 = vadd.s32 64, %v1394_v9  ;;  %v853_v63 = vld [vmem:[%s2104_s5 + $0x178] sm:$0xff]  ;;  %v832_v11 = vld [vmem:[%s2104_s5 + $0xd0] sm:$0xff]  ;;  %v851_v12 = vld [vmem:[%s2104_s5 + $0x168] sm:$0xff] }
  0x11   :  { %1121 = vmatpush.msk.msrb.mxu2 %vm246_vm5, %v1320_v30  ;;  %1090 = vmatpush.msk.msra.mxu0 %vm240_vm7, %v1320_v30  ;;  %vm243_vm2 = vcmp.eq.s32.totalorder %v1458_v28, %v1474_v32  ;;  %vm228_vm3 = vcmp.eq.s32.totalorder %v1506_v36, %v1438_v23  ;;  %vm229_vm4 = vcmp.eq.s32.totalorder %v1506_v36, %v1441_v24  ;;  %v1550_v39 = vadd.s32 56, %v1394_v9  ;;  %v817_v6 = vld [vmem:[%s2104_s5 + $0x58] sm:$0xff]  ;;  %v815_v13 = vld [vmem:[%s2104_s5 + $0x48] sm:$0xff]  ;;  %v850_v15 = vld [vmem:[%s2104_s5 + $0x160] sm:$0xff] }
  0x12   :  { %132 = vmatpush.msrb.mxu3 %v41_v31  ;;  %1105 = vmatpush.msk.msrb.mxu1 %vm245_vm6, %v1320_v30  ;;  %vm230_vm5 = vcmp.eq.s32.totalorder %v1506_v36, %v1444_v25  ;;  %vm239_vm6 = vcmp.eq.s32.totalorder %v1479_v33, %v1474_v32  ;;  %vm224_vm7 = vcmp.eq.s32.totalorder %v1520_v37, %v1438_v23  ;;  %v1565_v40 = vadd.s32 48, %v1394_v9  ;;  %v833_v7 = vld [vmem:[%s2104_s5 + $0xd8] sm:$0xff]  ;;  %v831_v14 = vld [vmem:[%s2104_s5 + $0xc8] sm:$0xff]  ;;  %v814_v16 = vld [vmem:[%s2104_s5 + $0x40] sm:$0xff] }
  0x13   :  { %1122 = vmatpush.msk.msrb.mxu2 %vm242_vm8, %v1320_v30  ;;  %1091 = vmatpush.msk.msra.mxu0 %vm236_vm11, %v1320_v30  ;;  %vm225_vm8 = vcmp.eq.s32.totalorder %v1520_v37, %v1441_v24  ;;  %vm220_vm11 = vcmp.eq.s32.totalorder %v1535_v38, %v1438_v23  ;;  %v1580_v41 = vadd.s32 40, %v1394_v9  ;;  %v1595_v42 = vadd.s32 32, %v1394_v9  ;;  %v813_v19 = vld [vmem:[%s2104_s5 + $0x38] sm:$0xff]  ;;  %v812_v22 = vld [vmem:[%s2104_s5 + $0x30] sm:$0xff]  ;;  %v827_v26 = vld [vmem:[%s2104_s5 + $0xa8] sm:$0xff] }
  0x14   :  { %133 = vmatpush.msrb.mxu3 %v37_v34  ;;  %1106 = vmatpush.msk.msrb.mxu1 %vm241_vm9, %v1320_v30  ;;  %vm226_vm9 = vcmp.eq.s32.totalorder %v1520_v37, %v1444_v25  ;;  %v1610_v43 = vadd.s32 24, %v1394_v9  ;;  %v1625_v44 = vadd.s32 16, %v1394_v9  ;;  %v1640_v45 = vadd.s32 8, %v1394_v9  ;;  %v846_v27 = vld [vmem:[%s2104_s5 + $0x140] sm:$0xff]  ;;  %v809_v31 = vld [vmem:[%s2104_s5 + $0x18] sm:$0xff]  ;;  %v808_v34 = vld [vmem:[%s2104_s5 + $0x10] sm:$0xff] }
  0x15   :  { %1019 = vmatmul.msk.f32.vlgmr.msrb.gmra.mxu3 %vm54_vm0, %v33_v18  ;;  %vm234_vm0 = vcmp.eq.s32.totalorder %v1494_v35, %v1444_v25  ;;  %1123 = vmatpush.msk.msrb.mxu2 %vm238_vm13, %v1320_v30  ;;  %vm222_vm13 = vcmp.eq.s32.totalorder %v1535_v38, %v1444_v25  ;;  %v495_v46 = vadd.s32 64, %v1429_v20  ;;  %v849_v18 = vld [vmem:[%s2104_s5 + $0x158] sm:$0xff]  ;;  %v826_v29 = vld [vmem:[%s2104_s5 + $0xa0] sm:$0xff] }
  0x16   :  { %1136 = vmatpush.msk.msra.mxu3 %vm251_vm10, %v1320_v30  ;;  %1107 = vmatpush.msk.msrb.mxu1 %vm237_vm12, %v1320_v30  ;;  %vm235_vm10 = vcmp.eq.s32.totalorder %v1494_v35, %v1474_v32  ;;  %vm221_vm12 = vcmp.eq.s32.totalorder %v1535_v38, %v1441_v24  ;;  %v829_v20 = vld [vmem:[%s2104_s5 + $0xb8] sm:$0xff] }
  0x17   :  { %1092 = vmatpush.msk.msra.mxu0 %vm232_vm15, %v1320_v30  ;;  %1124 = vmatpush.msk.msrb.mxu2 %vm234_vm0, %v1320_v30  ;;  %vm216_vm15 = vcmp.eq.s32.totalorder %v1550_v39, %v1438_v23  ;;  %vm218_vm0 = vcmp.eq.s32.totalorder %v1550_v39, %v1444_v25  ;;  %v1667_v47 = vperm.slane %v495_v46, 0  ;;  %v1675_v48 = vperm.slane %v495_v46, 1 }
  0x18   :  { %1137 = vmatpush.msk.msra.mxu3 %vm247_vm14, %v1320_v30  ;;  %1108 = vmatpush.msk.msrb.mxu1 %vm233_vm1, %v1320_v30  ;;  %vm231_vm14 = vcmp.eq.s32.totalorder %v1506_v36, %v1474_v32  ;;  %vm217_vm1 = vcmp.eq.s32.totalorder %v1550_v39, %v1441_v24  ;;  %v1677_v49 = vperm.slane %v495_v46, 2  ;;  %v1703_v50 = vperm.slane %v495_v46, 3  ;;  %v840_v46 = vld [vmem:[%s2104_s5 + $0x110] sm:$0xff] }
  0x19   :  { %1093 = vmatpush.msk.msra.mxu0 %vm228_vm3, %v1320_v30  ;;  %1125 = vmatpush.msk.msrb.mxu2 %vm230_vm5, %v1320_v30  ;;  %vm212_vm3 = vcmp.eq.s32.totalorder %v1565_v40, %v1438_v23  ;;  %vm214_vm5 = vcmp.eq.s32.totalorder %v1565_v40, %v1444_v25 }
  0x1a   :  { %1138 = vmatpush.msk.msra.mxu3 %vm243_vm2, %v1320_v30  ;;  %1109 = vmatpush.msk.msrb.mxu1 %vm229_vm4, %v1320_v30  ;;  %vm227_vm2 = vcmp.eq.s32.totalorder %v1520_v37, %v1474_v32  ;;  %vm213_vm4 = vcmp.eq.s32.totalorder %v1565_v40, %v1441_v24 }
  0x1b   :  { %1094 = vmatpush.msk.msra.mxu0 %vm224_vm7, %v1320_v30  ;;  %1126 = vmatpush.msk.msrb.mxu2 %vm226_vm9, %v1320_v30  ;;  %vm208_vm7 = vcmp.eq.s32.totalorder %v1580_v41, %v1438_v23  ;;  %vm210_vm9 = vcmp.eq.s32.totalorder %v1580_v41, %v1444_v25 }
  0x1c   :  { %1139 = vmatpush.msk.msra.mxu3 %vm239_vm6, %v1320_v30  ;;  %1110 = vmatpush.msk.msrb.mxu1 %vm225_vm8, %v1320_v30  ;;  %vm223_vm6 = vcmp.eq.s32.totalorder %v1535_v38, %v1474_v32  ;;  %vm209_vm8 = vcmp.eq.s32.totalorder %v1580_v41, %v1441_v24 }
  0x1d   :  { %1095 = vmatpush.msk.msra.mxu0 %vm220_vm11, %v1320_v30  ;;  %1127 = vmatpush.msk.msrb.mxu2 %vm222_vm13, %v1320_v30  ;;  %vm204_vm11 = vcmp.eq.s32.totalorder %v1595_v42, %v1438_v23  ;;  %vm206_vm13 = vcmp.eq.s32.totalorder %v1595_v42, %v1444_v25 }
  0x1e   :  { %1140 = vmatpush.msk.msra.mxu3 %vm235_vm10, %v1320_v30  ;;  %1111 = vmatpush.msk.msrb.mxu1 %vm221_vm12, %v1320_v30  ;;  %vm219_vm10 = vcmp.eq.s32.totalorder %v1550_v39, %v1474_v32  ;;  %vm205_vm12 = vcmp.eq.s32.totalorder %v1595_v42, %v1441_v24 }
  0x1f   :  { %1096 = vmatpush.msk.msra.mxu0 %vm216_vm15, %v1320_v30  ;;  %1128 = vmatpush.msk.msrb.mxu2 %vm218_vm0, %v1320_v30  ;;  %vm200_vm15 = vcmp.eq.s32.totalorder %v1610_v43, %v1438_v23  ;;  %vm202_vm0 = vcmp.eq.s32.totalorder %v1610_v43, %v1444_v25 }
  0x20   :  { %1141 = vmatpush.msk.msra.mxu3 %vm231_vm14, %v1320_v30  ;;  %1112 = vmatpush.msk.msrb.mxu1 %vm217_vm1, %v1320_v30  ;;  %vm215_vm14 = vcmp.eq.s32.totalorder %v1565_v40, %v1474_v32  ;;  %vm201_vm1 = vcmp.eq.s32.totalorder %v1610_v43, %v1441_v24 }
  0x21   :  { %1097 = vmatpush.msk.msra.mxu0 %vm212_vm3, %v1320_v30  ;;  %1129 = vmatpush.msk.msrb.mxu2 %vm214_vm5, %v1320_v30  ;;  %vm196_vm3 = vcmp.eq.s32.totalorder %v1625_v44, %v1438_v23  ;;  %vm198_vm5 = vcmp.eq.s32.totalorder %v1625_v44, %v1444_v25 }
  0x22   :  { %1142 = vmatpush.msk.msra.mxu3 %vm227_vm2, %v1320_v30  ;;  %1113 = vmatpush.msk.msrb.mxu1 %vm213_vm4, %v1320_v30  ;;  %vm211_vm2 = vcmp.eq.s32.totalorder %v1580_v41, %v1474_v32  ;;  %vm197_vm4 = vcmp.eq.s32.totalorder %v1625_v44, %v1441_v24 }
  0x23   :  { %1098 = vmatpush.msk.msra.mxu0 %vm208_vm7, %v1320_v30  ;;  %1130 = vmatpush.msk.msrb.mxu2 %vm210_vm9, %v1320_v30  ;;  %vm192_vm7 = vcmp.eq.s32.totalorder %v1640_v45, %v1438_v23  ;;  %vm194_vm9 = vcmp.eq.s32.totalorder %v1640_v45, %v1444_v25 }
  0x24   :  { %1143 = vmatpush.msk.msra.mxu3 %vm223_vm6, %v1320_v30  ;;  %1114 = vmatpush.msk.msrb.mxu1 %vm209_vm8, %v1320_v30  ;;  %vm207_vm6 = vcmp.eq.s32.totalorder %v1595_v42, %v1474_v32  ;;  %vm193_vm8 = vcmp.eq.s32.totalorder %v1640_v45, %v1441_v24 }
  0x25   :  { %1099 = vmatpush.msk.msra.mxu0 %vm204_vm11, %v1320_v30  ;;  %1131 = vmatpush.msk.msrb.mxu2 %vm206_vm13, %v1320_v30  ;;  %vm188_vm11 = vcmp.eq.s32.totalorder %v1394_v9, %v1438_v23  ;;  %vm190_vm13 = vcmp.eq.s32.totalorder %v1394_v9, %v1444_v25  ;;  %v828_v23 = vld [vmem:[%s2104_s5 + $0xb0] sm:$0xff]  ;;  %v811_v25 = vld [vmem:[%s2104_s5 + $0x28] sm:$0xff] }
  0x26   :  { %1144 = vmatpush.msk.msra.mxu3 %vm219_vm10, %v1320_v30  ;;  %1115 = vmatpush.msk.msrb.mxu1 %vm205_vm12, %v1320_v30  ;;  %vm203_vm10 = vcmp.eq.s32.totalorder %v1610_v43, %v1474_v32  ;;  %vm189_vm12 = vcmp.eq.s32.totalorder %v1394_v9, %v1441_v24  ;;  %v847_v24 = vld [vmem:[%s2104_s5 + $0x148] sm:$0xff] }
  0x27   :  { %1100 = vmatpush.msk.msra.mxu0 %vm200_vm15, %v1320_v30  ;;  %1132 = vmatpush.msk.msrb.mxu2 %vm202_vm0, %v1320_v30  ;;  %vm560_vm15 = vcmp.eq.s32.totalorder %v1418_v17, %v1667_v47  ;;  %vm562_vm0 = vcmp.eq.s32.totalorder %v1418_v17, %v1677_v49 }
  0x28   :  { %1145 = vmatpush.msk.msra.mxu3 %vm215_vm14, %v1320_v30  ;;  %1116 = vmatpush.msk.msrb.mxu1 %vm201_vm1, %v1320_v30  ;;  %vm199_vm14 = vcmp.eq.s32.totalorder %v1625_v44, %v1474_v32  ;;  %vm561_vm1 = vcmp.eq.s32.totalorder %v1418_v17, %v1675_v48 }
  0x29   :  { %1101 = vmatpush.msk.msra.mxu0 %vm196_vm3, %v1320_v30  ;;  %1133 = vmatpush.msk.msrb.mxu2 %vm198_vm5, %v1320_v30  ;;  %vm556_vm3 = vcmp.eq.s32.totalorder %v1432_v21, %v1667_v47  ;;  %vm558_vm5 = vcmp.eq.s32.totalorder %v1432_v21, %v1677_v49 }
  0x2a   :  { %1146 = vmatpush.msk.msra.mxu3 %vm211_vm2, %v1320_v30  ;;  %1117 = vmatpush.msk.msrb.mxu1 %vm197_vm4, %v1320_v30  ;;  %vm195_vm2 = vcmp.eq.s32.totalorder %v1640_v45, %v1474_v32  ;;  %vm557_vm4 = vcmp.eq.s32.totalorder %v1432_v21, %v1675_v48 }
  0x2b   :  { %1102 = vmatpush.msk.msra.mxu0 %vm192_vm7, %v1320_v30  ;;  %1134 = vmatpush.msk.msrb.mxu2 %vm194_vm9, %v1320_v30  ;;  %vm552_vm7 = vcmp.eq.s32.totalorder %v1458_v28, %v1667_v47  ;;  %vm553_vm9 = vcmp.eq.s32.totalorder %v1458_v28, %v1675_v48 }
  0x2c   :  { %1147 = vmatpush.msk.msra.mxu3 %vm207_vm6, %v1320_v30  ;;  %1118 = vmatpush.msk.msrb.mxu1 %vm193_vm8, %v1320_v30  ;;  %vm191_vm6 = vcmp.eq.s32.totalorder %v1394_v9, %v1474_v32  ;;  %vm563_vm8 = vcmp.eq.s32.totalorder %v1418_v17, %v1703_v50  ;;  %v830_v17 = vld [vmem:[%s2104_s5 + $0xc0] sm:$0xff]  ;;  %v825_v32 = vld [vmem:[%s2104_s5 + $0x98] sm:$0xff] }
  0x2d   :  { %1103 = vmatpush.msk.msra.mxu0 %vm188_vm11, %v1320_v30  ;;  %1135 = vmatpush.msk.msrb.mxu2 %vm190_vm13, %v1320_v30  ;;  %vm548_vm11 = vcmp.eq.s32.totalorder %v1479_v33, %v1667_v47  ;;  %vm549_vm13 = vcmp.eq.s32.totalorder %v1479_v33, %v1675_v48 }
  0x2e   :  { %1148 = vmatpush.msk.msra.mxu3 %vm203_vm10, %v1320_v30  ;;  %1119 = vmatpush.msk.msrb.mxu1 %vm189_vm12, %v1320_v30  ;;  %vm554_vm10 = vcmp.eq.s32.totalorder %v1458_v28, %v1677_v49  ;;  %vm559_vm12 = vcmp.eq.s32.totalorder %v1432_v21, %v1703_v50  ;;  %v848_v21 = vld [vmem:[%s2104_s5 + $0x150] sm:$0xff] }
  0x2f   :  { %1216 = vmatpush.msk.msrb.mxu0 %vm560_vm15, %v1320_v30  ;;  %1248 = vmatpush.msk.msra.mxu2 %vm562_vm0, %v1320_v30  ;;  %vm555_vm15 = vcmp.eq.s32.totalorder %v1458_v28, %v1703_v50  ;;  %vm544_vm0 = vcmp.eq.s32.totalorder %v1494_v35, %v1667_v47  ;;  %v810_v28 = vld [vmem:[%s2104_s5 + $0x20] sm:$0xff] }
  0x30   :  { %1149 = vmatpush.msk.msra.mxu3 %vm199_vm14, %v1320_v30  ;;  %1232 = vmatpush.msk.msra.mxu1 %vm561_vm1, %v1320_v30  ;;  %vm550_vm14 = vcmp.eq.s32.totalorder %v1479_v33, %v1677_v49  ;;  %vm551_vm1 = vcmp.eq.s32.totalorder %v1479_v33, %v1703_v50  ;;  %v844_v33 = vld [vmem:[%s2104_s5 + $0x130] sm:$0xff] }
  0x31   :  { %1217 = vmatpush.msk.msrb.mxu0 %vm556_vm3, %v1320_v30  ;;  %1249 = vmatpush.msk.msra.mxu2 %vm558_vm5, %v1320_v30  ;;  %vm546_vm3 = vcmp.eq.s32.totalorder %v1494_v35, %v1677_v49  ;;  %vm540_vm5 = vcmp.eq.s32.totalorder %v1506_v36, %v1667_v47 }
  0x32   :  { %1150 = vmatpush.msk.msra.mxu3 %vm195_vm2, %v1320_v30  ;;  %1233 = vmatpush.msk.msra.mxu1 %vm557_vm4, %v1320_v30  ;;  %vm545_vm2 = vcmp.eq.s32.totalorder %v1494_v35, %v1675_v48  ;;  %vm547_vm4 = vcmp.eq.s32.totalorder %v1494_v35, %v1703_v50  ;;  %v824_v35 = vld [vmem:[%s2104_s5 + $0x90] sm:$0xff] }
  0x33   :  { %1218 = vmatpush.msk.msrb.mxu0 %vm552_vm7, %v1320_v30  ;;  %1250 = vmatpush.msk.msra.mxu2 %vm554_vm10, %v1320_v30  ;;  %vm542_vm7 = vcmp.eq.s32.totalorder %v1506_v36, %v1677_v49  ;;  %vm537_vm10 = vcmp.eq.s32.totalorder %v1520_v37, %v1675_v48 }
  0x34   :  { %1151 = vmatpush.msk.msra.mxu3 %vm191_vm6, %v1320_v30  ;;  %1234 = vmatpush.msk.msra.mxu1 %vm553_vm9, %v1320_v30  ;;  %vm541_vm6 = vcmp.eq.s32.totalorder %v1506_v36, %v1675_v48  ;;  %vm536_vm9 = vcmp.eq.s32.totalorder %v1520_v37, %v1667_v47 }
  0x35   :  { %1219 = vmatpush.msk.msrb.mxu0 %vm548_vm11, %v1320_v30  ;;  %1251 = vmatpush.msk.msra.mxu2 %vm550_vm14, %v1320_v30  ;;  %vm538_vm11 = vcmp.eq.s32.totalorder %v1520_v37, %v1677_v49  ;;  %vm533_vm14 = vcmp.eq.s32.totalorder %v1535_v38, %v1675_v48 }
  0x36   :  { %1264 = vmatpush.msk.msrb.mxu3 %vm563_vm8, %v1320_v30  ;;  %1235 = vmatpush.msk.msra.mxu1 %vm549_vm13, %v1320_v30  ;;  %vm543_vm8 = vcmp.eq.s32.totalorder %v1506_v36, %v1703_v50  ;;  %vm532_vm13 = vcmp.eq.s32.totalorder %v1535_v38, %v1667_v47  ;;  %v843_v36 = vld [vmem:[%s2104_s5 + $0x128] sm:$0xff] }
  0x37   :  { %1220 = vmatpush.msk.msrb.mxu0 %vm544_vm0, %v1320_v30  ;;  %1252 = vmatpush.msk.msra.mxu2 %vm546_vm3, %v1320_v30  ;;  %vm528_vm0 = vcmp.eq.s32.totalorder %v1550_v39, %v1667_v47  ;;  %vm530_vm3 = vcmp.eq.s32.totalorder %v1550_v39, %v1677_v49 }
  0x38   :  { %1265 = vmatpush.msk.msrb.mxu3 %vm559_vm12, %v1320_v30  ;;  %1236 = vmatpush.msk.msra.mxu1 %vm545_vm2, %v1320_v30  ;;  %vm539_vm12 = vcmp.eq.s32.totalorder %v1520_v37, %v1703_v50  ;;  %vm529_vm2 = vcmp.eq.s32.totalorder %v1550_v39, %v1675_v48  ;;  %v166_v37 = vld [vmem:[%s2103_s4] sm:$0xf]  ;;  %s1007_s4 = sshll.u32 %s2108_s9, 4  ;;  %s1008_s4 = int_to_ptr.hbm [resolvable:$true] %s1007_s4 }
  0x39   :  { %1221 = vmatpush.msk.msrb.mxu0 %vm540_vm5, %v1320_v30  ;;  %1253 = vmatpush.msk.msra.mxu2 %vm542_vm7, %v1320_v30  ;;  %vm524_vm5 = vcmp.eq.s32.totalorder %v1565_v40, %v1667_v47  ;;  %vm526_vm7 = vcmp.eq.s32.totalorder %v1565_v40, %v1677_v49 }
  0x3a   :  { %1266 = vmatpush.msk.msrb.mxu3 %vm555_vm15, %v1320_v30  ;;  %1237 = vmatpush.msk.msra.mxu1 %vm541_vm6, %v1320_v30  ;;  %vm534_vm15 = vcmp.eq.s32.totalorder %v1535_v38, %v1677_v49  ;;  %vm525_vm6 = vcmp.eq.s32.totalorder %v1565_v40, %v1675_v48 }
  0x3b   :  { %1222 = vmatpush.msk.msrb.mxu0 %vm536_vm9, %v1320_v30  ;;  %1254 = vmatpush.msk.msra.mxu2 %vm538_vm11, %v1320_v30  ;;  %vm520_vm9 = vcmp.eq.s32.totalorder %v1580_v41, %v1667_v47  ;;  %vm522_vm11 = vcmp.eq.s32.totalorder %v1580_v41, %v1677_v49 }
  0x3c   :  { %1267 = vmatpush.msk.msrb.mxu3 %vm551_vm1, %v1320_v30  ;;  %1238 = vmatpush.msk.msra.mxu1 %vm537_vm10, %v1320_v30  ;;  %vm535_vm1 = vcmp.eq.s32.totalorder %v1535_v38, %v1703_v50  ;;  %vm521_vm10 = vcmp.eq.s32.totalorder %v1580_v41, %v1675_v48  ;;  %v807_v38 = vld [vmem:[%s2104_s5 + $0x8] sm:$0xff] }
  0x3d   :  { %1223 = vmatpush.msk.msrb.mxu0 %vm532_vm13, %v1320_v30  ;;  %1255 = vmatpush.msk.msra.mxu2 %vm534_vm15, %v1320_v30  ;;  %vm516_vm13 = vcmp.eq.s32.totalorder %v1595_v42, %v1667_v47  ;;  %vm518_vm15 = vcmp.eq.s32.totalorder %v1595_v42, %v1677_v49 }
  0x3e   :  { %1268 = vmatpush.msk.msrb.mxu3 %vm547_vm4, %v1320_v30  ;;  %1239 = vmatpush.msk.msra.mxu1 %vm533_vm14, %v1320_v30  ;;  %vm531_vm4 = vcmp.eq.s32.totalorder %v1550_v39, %v1703_v50  ;;  %vm517_vm14 = vcmp.eq.s32.totalorder %v1595_v42, %v1675_v48  ;;  %v823_v39 = vld [vmem:[%s2104_s5 + $0x88] sm:$0xff] }
  0x3f   :  { %1224 = vmatpush.msk.msrb.mxu0 %vm528_vm0, %v1320_v30  ;;  %1256 = vmatpush.msk.msra.mxu2 %vm530_vm3, %v1320_v30  ;;  %vm512_vm0 = vcmp.eq.s32.totalorder %v1610_v43, %v1667_v47  ;;  %vm514_vm3 = vcmp.eq.s32.totalorder %v1610_v43, %v1677_v49 }
  0x40   :  { %1269 = vmatpush.msk.msrb.mxu3 %vm543_vm8, %v1320_v30  ;;  %1240 = vmatpush.msk.msra.mxu1 %vm529_vm2, %v1320_v30  ;;  %vm527_vm8 = vcmp.eq.s32.totalorder %v1565_v40, %v1703_v50  ;;  %vm513_vm2 = vcmp.eq.s32.totalorder %v1610_v43, %v1675_v48  ;;  %v842_v40 = vld [vmem:[%s2104_s5 + $0x120] sm:$0xff] }
  0x41   :  { %1225 = vmatpush.msk.msrb.mxu0 %vm524_vm5, %v1320_v30  ;;  %1257 = vmatpush.msk.msra.mxu2 %vm526_vm7, %v1320_v30  ;;  %vm508_vm5 = vcmp.eq.s32.totalorder %v1625_v44, %v1667_v47  ;;  %vm510_vm7 = vcmp.eq.s32.totalorder %v1625_v44, %v1677_v49 }
  0x42   :  { %1270 = vmatpush.msk.msrb.mxu3 %vm539_vm12, %v1320_v30  ;;  %1241 = vmatpush.msk.msra.mxu1 %vm525_vm6, %v1320_v30  ;;  %vm523_vm12 = vcmp.eq.s32.totalorder %v1580_v41, %v1703_v50  ;;  %vm509_vm6 = vcmp.eq.s32.totalorder %v1625_v44, %v1675_v48  ;;  %v167_v41 = vperm.slane %v166_v37, 0 }
  0x43   :  { %1226 = vmatpush.msk.msrb.mxu0 %vm520_vm9, %v1320_v30  ;;  %1258 = vmatpush.msk.msra.mxu2 %vm522_vm11, %v1320_v30  ;;  %vm504_vm9 = vcmp.eq.s32.totalorder %v1640_v45, %v1667_v47  ;;  %vm506_vm11 = vcmp.eq.s32.totalorder %v1640_v45, %v1677_v49 }
  0x44   :  { %1271 = vmatpush.msk.msrb.mxu3 %vm535_vm1, %v1320_v30  ;;  %1242 = vmatpush.msk.msra.mxu1 %vm521_vm10, %v1320_v30  ;;  %vm519_vm1 = vcmp.eq.s32.totalorder %v1595_v42, %v1703_v50  ;;  %vm505_vm10 = vcmp.eq.s32.totalorder %v1640_v45, %v1675_v48  ;;  %v168_v42 = vperm.slane %v166_v37, 1 }
  0x45   :  { %1227 = vmatpush.msk.msrb.mxu0 %vm516_vm13, %v1320_v30  ;;  %1259 = vmatpush.msk.msra.mxu2 %vm518_vm15, %v1320_v30  ;;  %vm500_vm13 = vcmp.eq.s32.totalorder %v1394_v9, %v1667_v47  ;;  %vm502_vm15 = vcmp.eq.s32.totalorder %v1394_v9, %v1677_v49  ;;  %v839_v47 = vld [vmem:[%s2104_s5 + $0x108] sm:$0xff]  ;;  %v838_v49 = vld [vmem:[%s2104_s5 + $0x100] sm:$0xff] }
  0x46   :  { %1272 = vmatpush.msk.msrb.mxu3 %vm531_vm4, %v1320_v30  ;;  %1243 = vmatpush.msk.msra.mxu1 %vm517_vm14, %v1320_v30  ;;  %vm515_vm4 = vcmp.eq.s32.totalorder %v1610_v43, %v1703_v50  ;;  %vm501_vm14 = vcmp.eq.s32.totalorder %v1394_v9, %v1675_v48  ;;  %v806_v43 = vld [vmem:[%s2104_s5] sm:$0xff] }
  0x47   :  { %1228 = vmatpush.msk.msrb.mxu0 %vm512_vm0, %v1320_v30  ;;  %1260 = vmatpush.msk.msra.mxu2 %vm514_vm3, %v1320_v30  ;;  %vm171_vm0 = vcmp.eq.s32.totalorder %v1394_v9, %v167_v41  ;;  %v854_v48 = vld [vmem:[%s2104_s5 + $0x180] sm:$0xff] }
  0x48   :  { %1273 = vmatpush.msk.msrb.mxu3 %vm527_vm8, %v1320_v30  ;;  %1244 = vmatpush.msk.msra.mxu1 %vm513_vm2, %v1320_v30  ;;  %vm511_vm8 = vcmp.eq.s32.totalorder %v1625_v44, %v1703_v50  ;;  %v822_v44 = vld [vmem:[%s2104_s5 + $0x80] sm:$0xff]  ;;  %vm172_vm2 = vcmp.eq.s32.totalorder %v1394_v9, %v168_v42 }
  0x49   :  { %1229 = vmatpush.msk.msrb.mxu0 %vm508_vm5, %v1320_v30  ;;  %1261 = vmatpush.msk.msra.mxu2 %vm510_vm7, %v1320_v30  ;;  %vm482_vm5 = vcmask 64512   ;;  %vm801_vm7 = vcmp.eq.s32.totalorder %v1394_v9, 1 }
  0x4a   :  { %1274 = vmatpush.msk.msrb.mxu3 %vm523_vm12, %v1320_v30  ;;  %1245 = vmatpush.msk.msra.mxu1 %vm509_vm6, %v1320_v30  ;;  %vm507_vm12 = vcmp.eq.s32.totalorder %v1640_v45, %v1703_v50  ;;  %v841_v45 = vld [vmem:[%s2104_s5 + $0x118] sm:$0xff]  ;;  %vm490_vm6 = vcmp.eq.s32.totalorder %v1394_v9, 0 }
  0x4b   :  { %1230 = vmatpush.msk.msrb.mxu0 %vm504_vm9, %v1320_v30  ;;  %1262 = vmatpush.msk.msra.mxu2 %vm506_vm11, %v1320_v30  ;;  %vm974_vm9 = vcmask 74752  }
  0x4c   :  { %1275 = vmatpush.msk.msrb.mxu3 %vm519_vm1, %v1320_v30  ;;  %1246 = vmatpush.msk.msra.mxu1 %vm505_vm10, %v1320_v30  ;;  %vm503_vm1 = vcmp.eq.s32.totalorder %v1394_v9, %v1703_v50  ;;  %v1321_v50 = vmov 0.0  }
  0x4d   :  { %1231 = vmatpush.msk.msrb.mxu0 %vm500_vm13, %v1320_v30  ;;  %1263 = vmatpush.msk.msra.mxu2 %vm502_vm15, %v1320_v30 }
  0x4e   :  { %1276 = vmatpush.msk.msrb.mxu3 %vm515_vm4, %v1320_v30  ;;  %1247 = vmatpush.msk.msra.mxu1 %vm501_vm14, %v1320_v30 }
  0x50   :  { %1277 = vmatpush.msk.msrb.mxu3 %vm511_vm8, %v1320_v30  ;;  %vm950_vm8 = vcmask 261120  }
  0x52   :  { %1278 = vmatpush.msk.msrb.mxu3 %vm507_vm12, %v1320_v30 }
  0x54   :  { %1279 = vmatpush.msk.msrb.mxu3 %vm503_vm1, %v1320_v30  ;;  %v845_v30 = vld [vmem:[%s2104_s5 + $0x138] sm:$0xff] }
  0x7b   :  { %v145_v57 = vpop.permute.xlu0 %144 }
  0x8c   :  { %v95_v52 = vpop.f32.mrf.mxu1 }
  0x8e   :  { %v75_v51 = vpop.f32.mrf.mxu3  ;;  %v115_v54 = vpop.f32.mrf.mxu2 }
  0x8f   :  { %v138_v53 = vmax.f32 %v75_v51, %v95_v52  ;;  %v1020_v51 = vsel %vm171_vm0, 1.0, %v1321_v50  ;;  %v1021_v52 = vsel %vm172_vm2, 1.0, %v1321_v50 }
  0x91   :  { %v139_v55 = vmax.f32 %v138_v53, %v115_v54  ;;  %v169_v53 = vperm.slane %v166_v37, 2  ;;  %v170_v54 = vperm.slane %v166_v37, 3 }
  0x93   :  { %vm173_vm3 = vcmp.eq.s32.totalorder %v1394_v9, %v169_v53  ;;  %vm174_vm4 = vcmp.eq.s32.totalorder %v1394_v9, %v170_v54  ;;  %v942_v9 = vld [vmem:[%s2106_s7] sm:$0xff] }
  0x98   :  { %v135_v56 = vpop.f32.mrf.mxu3 }
  0x99   :  { %v140_v58 = vmax.f32 %v139_v55, %v135_v56 }
  0x9b   :  { %v147_v59 = vadd.f32 %v145_v57, %v140_v58 }
  0x9d   :  { %v148_v60 = vmax.f32 %v147_v59, 0.0 }
  0x9f   :  { %396 = vmatmul.f32.vlgmr.msra.gmra.mxu0 %v148_v60  ;;  %416 = vmatmul.f32.vlgmr.msrb.gmra.mxu1 %v148_v60 }
  0xa0   :  { %436 = vmatmul.f32.vlgmr.msrb.gmra.mxu2 %v148_v60  ;;  %456 = vmatmul.f32.vlgmr.msra.gmra.mxu3 %v148_v60 }
  0xa1   :  { %862 = vmatpush.msra.mxu0 %v821_v61  ;;  %882 = vmatpush.msrb.mxu1 %v837_v62 }
  0xa2   :  { %902 = vmatpush.msrb.mxu2 %v853_v63  ;;  %937 = vmatpush.msra.mxu3 %v854_v48  ;;  %v1022_v63 = vsel %vm173_vm3, 1.0, %v1321_v50 }
  0xa3   :  { %863 = vmatpush.msra.mxu0 %v820_v0  ;;  %883 = vmatpush.msrb.mxu1 %v836_v1  ;;  %v1023_v0 = vsel %vm174_vm4, 1.0, %v1321_v50 }
  0xa4   :  { %903 = vmatpush.msrb.mxu2 %v852_v8 }
  0xa5   :  { %864 = vmatpush.msra.mxu0 %v819_v2  ;;  %884 = vmatpush.msrb.mxu1 %v835_v3 }
  0xa6   :  { %904 = vmatpush.msrb.mxu2 %v851_v12 }
  0xa7   :  { %708 = vmatmul.f32.vlgmr.msrb.gmra.mxu0 %v148_v60  ;;  %728 = vmatmul.f32.vlgmr.msra.gmra.mxu1 %v148_v60 }
  0xa8   :  { %748 = vmatmul.f32.vlgmr.msra.gmra.mxu2 %v148_v60  ;;  %768 = vmatmul.f32.vlgmr.msrb.gmra.mxu3 %v148_v60 }
  0xa9   :  { %865 = vmatpush.msra.mxu0 %v818_v4  ;;  %885 = vmatpush.msrb.mxu1 %v834_v5 }
  0xaa   :  { %905 = vmatpush.msrb.mxu2 %v850_v15 }
  0xab   :  { %866 = vmatpush.msra.mxu0 %v817_v6  ;;  %886 = vmatpush.msrb.mxu1 %v833_v7 }
  0xac   :  { %906 = vmatpush.msrb.mxu2 %v849_v18 }
  0xad   :  { %867 = vmatpush.msra.mxu0 %v816_v10  ;;  %887 = vmatpush.msrb.mxu1 %v832_v11 }
  0xae   :  { %907 = vmatpush.msrb.mxu2 %v848_v21 }
  0xaf   :  { %868 = vmatpush.msra.mxu0 %v815_v13  ;;  %888 = vmatpush.msrb.mxu1 %v831_v14 }
  0xb0   :  { %908 = vmatpush.msrb.mxu2 %v847_v24 }
  0xb1   :  { %869 = vmatpush.msra.mxu0 %v814_v16  ;;  %889 = vmatpush.msrb.mxu1 %v830_v17 }
  0xb2   :  { %909 = vmatpush.msrb.mxu2 %v846_v27 }
  0xb3   :  { %870 = vmatpush.msra.mxu0 %v813_v19  ;;  %890 = vmatpush.msrb.mxu1 %v829_v20 }
  0xb4   :  { %910 = vmatpush.msrb.mxu2 %v845_v30 }
  0xb5   :  { %871 = vmatpush.msra.mxu0 %v812_v22  ;;  %891 = vmatpush.msrb.mxu1 %v828_v23 }
  0xb6   :  { %911 = vmatpush.msrb.mxu2 %v844_v33 }
  0xb7   :  { %872 = vmatpush.msra.mxu0 %v811_v25  ;;  %892 = vmatpush.msrb.mxu1 %v827_v26 }
  0xb8   :  { %912 = vmatpush.msrb.mxu2 %v843_v36 }
  0xb9   :  { %873 = vmatpush.msra.mxu0 %v810_v28  ;;  %893 = vmatpush.msrb.mxu1 %v826_v29 }
  0xba   :  { %913 = vmatpush.msrb.mxu2 %v842_v40 }
  0xbb   :  { %874 = vmatpush.msra.mxu0 %v809_v31  ;;  %894 = vmatpush.msrb.mxu1 %v825_v32 }
  0xbc   :  { %914 = vmatpush.msrb.mxu2 %v841_v45 }
  0xbd   :  { %875 = vmatpush.msra.mxu0 %v808_v34  ;;  %895 = vmatpush.msrb.mxu1 %v824_v35 }
  0xbe   :  { %915 = vmatpush.msrb.mxu2 %v840_v46 }
  0xbf   :  { %876 = vmatpush.msra.mxu0 %v807_v38  ;;  %896 = vmatpush.msrb.mxu1 %v823_v39 }
  0xc0   :  { %916 = vmatpush.msrb.mxu2 %v839_v47 }
  0xc1   :  { %877 = vmatpush.msra.mxu0 %v806_v43  ;;  %897 = vmatpush.msrb.mxu1 %v822_v44 }
  0xc2   :  { %917 = vmatpush.msrb.mxu2 %v838_v49 }
 0x11c   :  { %v397_v55 = vpop.f32.mrf.mxu0  ;;  %v417_v56 = vpop.f32.mrf.mxu1 }
 0x11d   :  { %v460_v57 = vmul.f32 %v1020_v51, %v397_v55  ;;  %v461_v58 = vmul.f32 %v1021_v52, %v417_v56 }
 0x11f   :  { %v464_v59 = vrot.slane %v460_v57, 4  ;;  %v470_v60 = vrot.slane %v461_v58, 4 }
 0x121   :  { %v465_v61 = vadd.f32 %v464_v59, %v460_v57  ;;  %v471_v62 = vadd.f32 %v470_v60, %v461_v58 }
 0x123   :  { %v466_v1 = vrot.slane %v465_v61, 2  ;;  %v472_v2 = vrot.slane %v471_v62, 2  ;;  %v437_v3 = vpop.f32.mrf.mxu2  ;;  %v457_v4 = vpop.f32.mrf.mxu3 }
 0x124   :  { %v462_v5 = vmul.f32 %v1022_v63, %v437_v3  ;;  %v463_v6 = vmul.f32 %v1023_v0, %v457_v4  ;;  %v709_v7 = vpop.f32.mrf.mxu0  ;;  %v729_v8 = vpop.f32.mrf.mxu1  ;;  %v945_v4 = vld [vmem:[%s2106_s7 + $0x18] sm:$0xff] }
 0x125   :  { %v467_v10 = vadd.f32 %v466_v1, %v465_v61  ;;  %v772_v11 = vmul.f32 %v1020_v51, %v709_v7  ;;  %v773_v12 = vmul.f32 %v1021_v52, %v729_v8  ;;  %v473_v15 = vadd.f32 %v472_v2, %v471_v62  ;;  %966 = vmatpush.msrb.mxu3 %v945_v4  ;;  %v1287_v7 = vld [vmem:[%s2105_s6] ss:$0 sm:$0xff]  ;;  %s1322_s6 = smov [#allocation2]  }
 0x126   :  { %v476_v13 = vrot.slane %v462_v5, 4  ;;  %v483_v14 = vsel %vm482_vm5, %v463_v6, 0.0  ;;  %v943_v6 = vld [vmem:[%s2106_s7 + $0x8] sm:$0xff] }
 0x127   :  { %v484_v16 = vrot.slane %v483_v14, 4  ;;  %v776_v17 = vrot.slane %v772_v11, 4  ;;  %v782_v19 = vrot.slane %v773_v12, 4  ;;  %v468_v20 = vrot.slane %v467_v10, 1 }
 0x128   :  { %v477_v18 = vadd.f32 %v476_v13, %v462_v5  ;;  %v474_v25 = vrot.slane %v473_v15, 1  ;;  %v944_v5 = vld [vmem:[%s2106_s7 + $0x10] sm:$0xff]  ;;  %s1005_s7 = sshll.u32 %s1322_s6, 4  ;;  %s1006_s7 = int_to_ptr.vmem [resolvable:$true] %s1005_s7 }
 0x129   :  { %v485_v21 = vadd.f32 %v484_v16, %v483_v14  ;;  %v777_v22 = vadd.f32 %v776_v17, %v772_v11  ;;  %v783_v24 = vadd.f32 %v782_v19, %v773_v12  ;;  %v469_v33 = vadd.f32 %v468_v20, %v467_v10  ;;  %967 = vmatpush.msrb.mxu3 %v944_v5  ;;  %v1288_v17 = vld [vmem:[%s2107_s8] ss:$0 sm:$0xff] }
 0x12a   :  { %v478_v23 = vrot.slane %v477_v18, 2  ;;  %v475_v40 = vadd.f32 %v474_v25, %v473_v15 }
 0x12b   :  { %v486_v26 = vrot.slane %v485_v21, 2  ;;  %v778_v27 = vrot.slane %v777_v22, 2  ;;  %v749_v28 = vpop.f32.mrf.mxu2  ;;  %v769_v29 = vpop.f32.mrf.mxu3  ;;  %v784_v30 = vrot.slane %v783_v24, 2  ;;  %v491_v51 = vsel %vm490_vm6, %v469_v33, 0.0  ;;  %968 = vmatpush.msrb.mxu3 %v943_v6 }
 0x12c   :  { %v774_v31 = vmul.f32 %v1022_v63, %v749_v28  ;;  %v775_v32 = vmul.f32 %v1023_v0, %v769_v29  ;;  %v479_v34 = vadd.f32 %v478_v23, %v477_v18  ;;  %v492_v54 = vsel %vm490_vm6, %v475_v40, 0.0 }
 0x12d   :  { %v779_v35 = vadd.f32 %v778_v27, %v777_v22  ;;  %v487_v36 = vadd.f32 %v486_v26, %v485_v21  ;;  %v785_v37 = vadd.f32 %v784_v30, %v783_v24  ;;  %969 = vmatpush.msrb.mxu3 %v942_v9 }
 0x12e   :  { %v788_v38 = vrot.slane %v774_v31, 4  ;;  %v794_v39 = vsel %vm482_vm5, %v775_v32, 0.0  ;;  %v480_v45 = vrot.slane %v479_v34, 1 }
 0x12f   :  { %v780_v41 = vrot.slane %v779_v35, 1  ;;  %v795_v42 = vrot.slane %v794_v39, 4  ;;  %v786_v43 = vrot.slane %v785_v37, 1  ;;  %v488_v48 = vrot.slane %v487_v36, 1 }
 0x130   :  { %v789_v44 = vadd.f32 %v788_v38, %v774_v31  ;;  %v481_v57 = vadd.f32 %v480_v45, %v479_v34 }
 0x131   :  { %v781_v46 = vadd.f32 %v780_v41, %v779_v35  ;;  %v796_v47 = vadd.f32 %v795_v42, %v794_v39  ;;  %v787_v49 = vadd.f32 %v786_v43, %v785_v37  ;;  %v489_v59 = vadd.f32 %v488_v48, %v487_v36 }
 0x132   :  { %v790_v50 = vrot.slane %v789_v44, 2  ;;  %v493_v0 = vsel %vm490_vm6, %v481_v57, 0.0 }
 0x133   :  { %v797_v52 = vrot.slane %v796_v47, 2  ;;  %v802_v53 = vsel %vm801_vm7, %v781_v46, %v491_v51  ;;  %v803_v56 = vsel %vm801_vm7, %v787_v49, %v492_v54  ;;  %v494_v2 = vsel %vm490_vm6, %v489_v59, 0.0 }
 0x134   :  { %v791_v55 = vadd.f32 %v790_v50, %v789_v44  ;;  %878 = vmatmul.f32.vlgmr.msra.gmra.mxu0 %v802_v53  ;;  %898 = vmatmul.f32.vlgmr.msrb.gmra.mxu1 %v803_v56 }
 0x135   :  { %v798_v58 = vadd.f32 %v797_v52, %v796_v47 }
 0x136   :  { %v792_v60 = vrot.slane %v791_v55, 1 }
 0x137   :  { %v799_v61 = vrot.slane %v798_v58, 1 }
 0x138   :  { %v793_v62 = vadd.f32 %v792_v60, %v791_v55 }
 0x139   :  { %v800_v63 = vadd.f32 %v799_v61, %v798_v58 }
 0x13a   :  { %v804_v1 = vsel %vm801_vm7, %v793_v62, %v493_v0 }
 0x13b   :  { %918 = vmatmul.f32.vlgmr.msrb.gmra.mxu2 %v804_v1  ;;  %v805_v3 = vsel %vm801_vm7, %v800_v63, %v494_v2 }
 0x13c   :  { %1280 = vmatmul.msk.f32.vlgmr.msra.gmra.mxu3 %vm482_vm5, %v805_v3 }
 0x1b1   :  { %v879_v8 = vpop.f32.mrf.mxu0  ;;  %v899_v11 = vpop.f32.mrf.mxu1 }
 0x1b2   :  { %v880_v10 = vadd.f32 %v1287_v7, %v879_v8 }
 0x1b4   :  { %v900_v12 = vadd.f32 %v899_v11, %v880_v10 }
 0x1be   :  { %v919_v13 = vpop.f32.mrf.mxu2 }
 0x1bf   :  { %v920_v14 = vadd.f32 %v919_v13, %v900_v12  ;;  %v939_v15 = vpop.f32.mrf.mxu3 }
 0x1c1   :  { %v940_v16 = vadd.f32 %v939_v15, %v920_v14 }
 0x1c3   :  { %1281 = vmatmul.msk.f32.vlgmr.msrb.gmra.mxu3 %vm950_vm8, %v940_v16 }
 0x246   :  { %v971_v18 = vpop.f32.mrf.mxu3 }
 0x247   :  { %v972_v19 = vadd.f32 %v1288_v17, %v971_v18 }
 0x249   :  { %v975_v20 = vsel %vm974_vm9, %v972_v19, -inf }
 0x24a   :  { %976 = vmax.xlane.f32.xlu0 %v975_v20 }
 0x2bd   :  { %v977_v21 = vpop.xlane.xlu0 %976 }
 0x2be   :  { %v978_v22 = vsub.f32 %v972_v19, %v977_v21 }
 0x2c0   :  { %v979_v23 = vmul.f32 1.442695, %v978_v22 }
 0x2c2   :  { %1289 = vpow2.f32 %v979_v23 }
 0x2c8   :  { %v1290_v24 = vpop.eup %1289 }
 0x2c9   :  { %v981_v25 = vsel %vm974_vm9, %v1290_v24, 0.0 }
 0x2ca   :  { %982 = vadd.xlane.f32.xlu1 %v981_v25 }
 0x33d   :  { %v983_v26 = vpop.xlane.xlu1 %982 }
 0x33e   :  { %1291 = vrcp.f32 %v983_v26  ;;  %v995_v30 = vand.u32 2147483648, %v983_v26  ;;  %v993_v32 = vand.u32 2147483647, %v983_v26  ;;  %vm989_vm11 = vweird.f32 %v983_v26 }
 0x340   :  { %v996_v34 = vor.u32 1.1754944e-38, %v995_v30  ;;  %vm994_vm13 = vcmp.eq.f32.partialorder %v993_v32, 8.507059e+37 }
 0x344   :  { %v1292_v27 = vpop.eup %1291 }
 0x345   :  { %v985_v28 = vmul.f32 %v1292_v27, %v983_v26  ;;  %vm990_vm10 = vweird.f32 %v1292_v27 }
 0x346   :  { %vm991_vm12 = vmor %vm989_vm11, %vm990_vm10 }
 0x347   :  { %v986_v29 = vsub.f32 1.0, %v985_v28 }
 0x349   :  { %v987_v31 = vmul.f32 %v1292_v27, %v986_v29 }
 0x34b   :  { %v988_v33 = vadd.f32 %v1292_v27, %v987_v31 }
 0x34d   :  { %v992_v35 = vsel %vm991_vm12, %v1292_v27, %v988_v33 }
 0x34e   :  { %v997_v36 = vsel %vm994_vm13, %v996_v34, %v992_v35 }
 0x34f   :  { %v998_v37 = vmul.f32 %v1290_v24, %v997_v36 }
 0x351   :  { %999 = vst.msk [vmem:[#allocation2] sm:$0x3] %vm974_vm9, %v998_v37 }
 0x352   :  { %1010 = dma.vmem_to_hbm [thread:$0]  %s1006_s7, 32, %s1008_s4, [#allocation3]  }
 0x353   :  { %1317 = dma.done.wait [#allocation3], 32  }
 0x354   :  { %1318 = vsyncadd [#allocation3], 4294967264 }
 0x355   :  { %1015 = vsyncpa [#allocation3], 1 }

</bundles_post_ra>
